<compile_context>
chip_gen: v7x
topology: tpu7x:2x2x1
jax: 0.10.0
libtpu: 0.0.40
codegen_flags: <defaults>
</compile_context>

<pallas_src>
import jax
import jax.numpy as jnp
from jax.experimental import pallas as pl
from jax.experimental.pallas import tpu as pltpu

# Problem sizes (from the PyTorch module / its example input x3 = randn(10, 20, 20))
B = 10        # batch
CIN = 20      # in channels
COUT = 20     # out channels
L = 20        # input length
K = 20        # kernel size
STRIDE = 2
PAD = 5
L_PAD = L + 2 * PAD                       # 30 (after circular padding)
L_OUT = (L_PAD - K) // STRIDE + 1         # 6

KDIM = CIN * L                            # 400 contraction length
N_VALID = COUT * L_OUT                    # 120 valid output columns
N_PAD = 128                               # columns padded to a full lane tile

# Static layout assumptions (review correctness concern: fail loudly if shapes change).
assert N_VALID <= N_PAD, "output columns must fit one 128-lane tile"
assert KDIM % 8 == 0, "contraction dim should be sublane aligned"


def conv_tanh_kernel(x_ref, w_ref, b_ref, o_ref):
    # x_ref: (B, KDIM) f32   w_ref: (KDIM, N_PAD) bf16   b_ref: (1, N_PAD) f32
    # o_ref: (B, N_PAD) f32
    x = x_ref[...].astype(jnp.bfloat16)                               # cast hidden under DMA
    acc = jnp.dot(x, w_ref[...], preferred_element_type=jnp.float32)  # (B, 128) f32 on MXU
    o_ref[...] = jnp.tanh(acc + b_ref[...])                           # lane-dense store


def prepare_params(weight, bias):
    """One-time parameter re-layout (constant fold path, NOT in the per-call jit).

    weight: (COUT, CIN, K) f32 ; bias: (COUT,) f32
    returns w3: (KDIM, N_PAD) bf16 ; b2: (1, N_PAD) f32
      W3[cin*L + j, c*L_OUT + l] = weight[c, cin, (j - STRIDE*l + PAD) % K]
    which folds both the circular padding and the im2col into the GEMM weight.
    """
    j = jnp.arange(L)
    l = jnp.arange(L_OUT)
    k_idx = (j[None, :] - STRIDE * l[:, None] + PAD) % K          # (L_OUT, L)
    w_g = weight[:, :, k_idx]                                     # (COUT, CIN, L_OUT, L)
    w3 = jnp.transpose(w_g, (1, 3, 0, 2)).reshape(KDIM, N_VALID)  # (400, 120)
    w3 = jnp.pad(w3, ((0, 0), (0, N_PAD - N_VALID))).astype(jnp.bfloat16)
    b2 = jnp.pad(jnp.repeat(bias, L_OUT), (0, N_PAD - N_VALID)).reshape(1, N_PAD)
    return jax.block_until_ready(w3), jax.block_until_ready(b2)


@jax.jit
def conv1d_circular_tanh(x, w3, b2):
    """x: (B, CIN, L) f32; w3/b2 from prepare_params -> (B, COUT, L_OUT) f32."""
    x2 = x.reshape(B, KDIM)                    # free row-major reshape (no data movement)

    out = pl.pallas_call(
        conv_tanh_kernel,
        out_shape=jax.ShapeDtypeStruct((B, N_PAD), jnp.float32),
        in_specs=[
            pl.BlockSpec(memory_space=pltpu.MemorySpace.VMEM),
            pl.BlockSpec(memory_space=pltpu.MemorySpace.VMEM),
            pl.BlockSpec(memory_space=pltpu.MemorySpace.VMEM),
        ],
        out_specs=pl.BlockSpec(memory_space=pltpu.MemorySpace.VMEM),
        cost_estimate=pl.CostEstimate(
            flops=2 * B * KDIM * N_PAD,
            transcendentals=B * N_PAD,
            bytes_accessed=(B * KDIM * 4 + KDIM * N_PAD * 2
                            + N_PAD * 4 + B * N_PAD * 4),
        ),
    )(x2, w3, b2)

    # Columns are already in (COUT, L_OUT) order, so no transpose — just drop the
    # padded lanes.  Kept inside the jit so XLA fuses it with the custom-call output.
    return out[:, :N_VALID].reshape(B, COUT, L_OUT)


if __name__ == "__main__":
    key = jax.random.PRNGKey(0)
    kx, kw, kb = jax.random.split(key, 3)

    # Deterministic parameter init (matching Conv1d parameter shapes).
    fan_in = CIN * K
    bound = 1.0 / jnp.sqrt(jnp.float32(fan_in))
    weight = jax.random.uniform(kw, (COUT, CIN, K), jnp.float32, -bound, bound)
    bias = jax.random.uniform(kb, (COUT,), jnp.float32, -bound, bound)

    # Example input (same shape as the module's x3 = torch.randn(10, 20, 20)).
    x3 = jax.random.normal(kx, (B, CIN, L), jnp.float32)

    # One-time constant fold of the circulant weight / bias (outside the hot path).
    w3, b2 = prepare_params(weight, bias)

    y = conv1d_circular_tanh(x3, w3, b2)
    jax.block_until_ready(y)
    assert y.shape == (B, COUT, L_OUT), y.shape

    # Pure-JAX reference with the same bf16 operand quantization + f32 accumulation.
    x_pad = jnp.concatenate([x3[..., -PAD:], x3, x3[..., :PAD]], axis=-1)
    win = jnp.arange(L_OUT)[:, None] * STRIDE + jnp.arange(K)[None, :]
    patches = x_pad[:, :, win]                                    # (B, CIN, L_OUT, K)
    ref = jnp.einsum(
        "bilk,cik->bcl",
        patches.astype(jnp.bfloat16).astype(jnp.float32),
        weight.astype(jnp.bfloat16).astype(jnp.float32),
        precision=jax.lax.Precision.HIGHEST,
    ) + bias[None, :, None]
    ref = jnp.tanh(ref)
    assert jnp.allclose(y, ref, atol=2e-3, rtol=2e-3), float(jnp.max(jnp.abs(y - ref)))

    print("KERNEL_OK")
</pallas_src>

<mosaic_0001>
module attributes {stable_mosaic.version = 11 : i64} {
  func.func @conv_tanh_kernel(%arg0: memref<10x400xf32, #tpu.memory_space<vmem>>, %arg1: memref<400x128xbf16, #tpu.memory_space<vmem>>, %arg2: memref<1x128xf32, #tpu.memory_space<vmem>>, %arg3: memref<10x128xf32, #tpu.memory_space<vmem>>) attributes {dimension_semantics = [], scalar_prefetch = 0 : i64, scratch_operands = 0 : i64, tpu.core_type = #tpu.core_type<tc>} {
    %c0 = arith.constant 0 : index
    %c0_0 = arith.constant 0 : index
    %0 = vector.load %arg0[%c0, %c0_0] : memref<10x400xf32, #tpu.memory_space<vmem>>, vector<10x400xf32>
    %1 = arith.truncf %0 : vector<10x400xf32> to vector<10x400xbf16>
    %c0_1 = arith.constant 0 : index
    %c0_2 = arith.constant 0 : index
    %2 = vector.load %arg1[%c0_1, %c0_2] : memref<400x128xbf16, #tpu.memory_space<vmem>>, vector<400x128xbf16>
    %cst = arith.constant dense<0.000000e+00> : vector<10x128xf32>
    %3 = tpu.matmul %1, %2, %cst {dimension_numbers = #tpu.dot_dimension_numbers<[1], [0], [0], [1], [0, 0, 1, 1], [], []>} : vector<10x400xbf16>, vector<400x128xbf16>, vector<10x128xf32> -> vector<10x128xf32>
    %c0_3 = arith.constant 0 : index
    %c0_4 = arith.constant 0 : index
    %4 = vector.load %arg2[%c0_3, %c0_4] : memref<1x128xf32, #tpu.memory_space<vmem>>, vector<1x128xf32>
    %5 = vector.broadcast %4 : vector<1x128xf32> to vector<10x128xf32>
    %6 = arith.addf %3, %5 : vector<10x128xf32>
    %7 = math.tanh %6 : vector<10x128xf32>
    %c0_5 = arith.constant 0 : index
    %c0_6 = arith.constant 0 : index
    %8 = vector.load %arg3[%c0_5, %c0_6] : memref<10x128xf32, #tpu.memory_space<vmem>>, vector<10x128xf32>
    tpu.vector_store %arg3[%c0_5, %c0_6], %7 {strides = array<i32>} : memref<10x128xf32, #tpu.memory_space<vmem>>, vector<10x128xf32>,
    return
  }
}

</mosaic_0001>

<bundles_post_ra>
// kernel: conv1d_circular_tanh.1
= control target key start
LH: loop header
LB: loop body
LE: loop exit
PB: predicated region body
PF: predicated region fallthrough
CT: control target
= control target key end

     0   :  { %v407_v0 = vmov 0   ;;  %vm234_vm0 = vcmask 130048   ;;  %s545_s1 = inlined_call_operand.vmem [shape: bf16[400,128], index: 1, kind: input, shape index: {}]   ;;  %s546_s0 = inlined_call_operand.vmem [shape: f32[10,400], index: 0, kind: input, shape index: {}]   ;;  %s547_s2 = inlined_call_operand.vmem [shape: f32[1,128], index: 2, kind: input, shape index: {}]   ;;  %s548_s3 = inlined_call_operand.vmem [shape: f32[10,128], index: 3, kind: output, shape index: {}]  }
   0x1   :  { %279 = vmatprep.subr.bf16.mxu1 %v407_v0  ;;  %v378_v1 = vld [vmem:[%s545_s1 + $0x40] sm:$0xff]   ;;  %v381_v4 = vld [vmem:[%s545_s1 + $0x48] sm:$0xff]   ;;  %v384_v7 = vld [vmem:[%s545_s1 + $0x50] sm:$0xff]  }
   0x2   :  { %v379_v2 = vld [vmem:[%s545_s1 + $0x80] sm:$0xff]   ;;  %355 = vmatprep.subr.bf16.mxu0 %v378_v1  ;;  %v382_v5 = vld [vmem:[%s545_s1 + $0x88] sm:$0xff]   ;;  %v385_v8 = vld [vmem:[%s545_s1 + $0x90] sm:$0xff]  }
   0x3   :  { %v380_v3 = vld [vmem:[%s545_s1] sm:$0xff]   ;;  %280 = vmatpush1.bf16.msra.mxu1 %v379_v2  ;;  %v383_v6 = vld [vmem:[%s545_s1 + $0x8] sm:$0xff]   ;;  %v386_v9 = vld [vmem:[%s545_s1 + $0x10] sm:$0xff]  }
   0x4   :  { %356 = vmatpush3.bf16.msra.mxu0 %v380_v3  ;;  %281 = vmatprep.subr.bf16.mxu1 %v407_v0  ;;  %v387_v10 = vld [vmem:[%s545_s1 + $0x58] sm:$0xff]   ;;  %v390_v13 = vld [vmem:[%s545_s1 + $0x60] sm:$0xff]   ;;  %v393_v16 = vld [vmem:[%s545_s1 + $0x68] sm:$0xff]  }
   0x5   :  { %357 = vmatprep.subr.bf16.mxu0 %v381_v4  ;;  %v388_v11 = vld [vmem:[%s545_s1 + $0x98] sm:$0xff]   ;;  %v391_v14 = vld [vmem:[%s545_s1 + $0xa0] sm:$0xff]   ;;  %v394_v17 = vld [vmem:[%s545_s1 + $0xa8] sm:$0xff]  }
   0x6   :  { %v389_v12 = vld [vmem:[%s545_s1 + $0x18] sm:$0xff]   ;;  %v392_v15 = vld [vmem:[%s545_s1 + $0x20] sm:$0xff]   ;;  %v395_v18 = vld [vmem:[%s545_s1 + $0x28] sm:$0xff]  }
   0x7   :  { %282 = vmatpush1.bf16.msra.mxu1 %v382_v5  ;;  %v396_v19 = vld [vmem:[%s545_s1 + $0x70] sm:$0xff]   ;;  %v16_v22 = vld [vmem:[%s546_s0 + $0x8] sm:$0xff]  ;;  %v399_v24 = vld [vmem:[%s545_s1 + $0x78] sm:$0xff]  }
   0x8   :  { %358 = vmatpush3.bf16.msra.mxu0 %v383_v6  ;;  %283 = vmatprep.subr.bf16.mxu1 %v407_v0  ;;  %v397_v20 = vld [vmem:[%s545_s1 + $0xb0] sm:$0xff]   ;;  %v20_v23 = vld [vmem:[%s546_s0 + $0x28] sm:$0x3]  ;;  %v18_v26 = vld [vmem:[%s546_s0 + $0x18] sm:$0xff] }
   0x9   :  { %359 = vmatprep.subr.bf16.mxu0 %v384_v7  ;;  %v398_v21 = vld [vmem:[%s545_s1 + $0x30] sm:$0xff]   ;;  %v24_v25 = vpack.c.bf16 %v20_v23, %v16_v22  ;;  %v22_v27 = vld [vmem:[%s546_s0 + $0x38] sm:$0x3]  ;;  %v15_v31 = vld [vmem:[%s546_s0] sm:$0xff] }
   0xa   :  { %v400_v28 = vld [vmem:[%s545_s1 + $0xb8] sm:$0xff]   ;;  %v26_v29 = vpack.c.bf16 %v22_v27, %v18_v26  ;;  %v19_v32 = vld [vmem:[%s546_s0 + $0x20] sm:$0x3]  ;;  %v17_v35 = vld [vmem:[%s546_s0 + $0x10] sm:$0xff] }
   0xb   :  { %284 = vmatpush1.bf16.msra.mxu1 %v385_v8  ;;  %270 = vmatprep.mubr.bf16.mxu0 %v24_v25  ;;  %v401_v30 = vld [vmem:[%s545_s1 + $0x38] sm:$0xff]   ;;  %v23_v33 = vpack.c.bf16 %v19_v32, %v15_v31  ;;  %v402_v34 = vld [vmem:[%s545_s1 + $0xc0] sm:$0xff]   ;;  %v21_v36 = vld [vmem:[%s546_s0 + $0x30] sm:$0x3] }
   0xc   :  { %360 = vmatpush3.bf16.msra.mxu0 %v386_v9  ;;  %285 = vmatprep.subr.bf16.mxu1 %v407_v0  ;;  %v25_v37 = vpack.c.bf16 %v21_v36, %v17_v35  ;;  %v328_v40 = vld [vmem:[%s547_s2] ss:$0 sm:$0xff] }
   0xd   :  { %361 = vmatprep.subr.bf16.mxu0 %v387_v10  ;;  %354 = vmatprep.mubr.msk.bf16.mxu1 %vm234_vm0, %v26_v29 }
   0xf   :  { %286 = vmatpush1.bf16.msra.mxu1 %v388_v11 }
  0x10   :  { %362 = vmatpush3.bf16.msra.mxu0 %v389_v12  ;;  %287 = vmatprep.subr.bf16.mxu1 %v407_v0 }
  0x11   :  { %363 = vmatprep.subr.bf16.mxu0 %v390_v13 }
  0x13   :  { %288 = vmatpush1.bf16.msra.mxu1 %v391_v14 }
  0x14   :  { %364 = vmatpush3.bf16.msra.mxu0 %v392_v15  ;;  %289 = vmatprep.subr.bf16.mxu1 %v407_v0 }
  0x15   :  { %365 = vmatprep.subr.bf16.mxu0 %v393_v16 }
  0x17   :  { %290 = vmatpush1.bf16.msra.mxu1 %v394_v17 }
  0x18   :  { %366 = vmatpush3.bf16.msra.mxu0 %v395_v18  ;;  %291 = vmatprep.subr.bf16.mxu1 %v407_v0 }
  0x19   :  { %367 = vmatprep.subr.bf16.mxu0 %v396_v19 }
  0x1b   :  { %292 = vmatpush1.bf16.msra.mxu1 %v397_v20 }
  0x1c   :  { %368 = vmatpush3.bf16.msra.mxu0 %v398_v21  ;;  %293 = vmatprep.subr.bf16.mxu1 %v407_v0 }
  0x1d   :  { %369 = vmatprep.subr.bf16.mxu0 %v399_v24 }
  0x1f   :  { %294 = vmatpush1.bf16.msra.mxu1 %v400_v28 }
  0x20   :  { %370 = vmatpush3.bf16.msra.mxu0 %v401_v30  ;;  %295 = vmatprep.subr.bf16.mxu1 %v407_v0 }
  0x23   :  { %271 = vmatmul.mubr.bf16.vlgmr.msra.gmra.mrb[0].mxu0 %v23_v33  ;;  %296 = vmatpush1.bf16.msra.mxu1 %v402_v34 }
  0x26   :  { %312 = vmatmul.mubr.bf16.vlgmr.msra.gmra.mrb[0].mxu1 %v25_v37 }
  0xf6   :  { %v371_v38 = vpop.f32.mrb[0].mxu0 }
  0xf7   :  { %v372_v39 = vpop.f32.mrb[1].mxu0 }
  0xf8   :  { %v373_v41 = vadd.f32 %v372_v39, %v371_v38  ;;  %v374_v42 = vpop.f32.mrb[2].mxu0 }
  0xf9   :  { %v375_v43 = vpop.f32.mrb[3].mxu0  ;;  %v313_v44 = vpop.f32.mrb[0].mxu1 }
  0xfa   :  { %v376_v45 = vadd.f32 %v375_v43, %v374_v42  ;;  %v273_v46 = vadd.f32 %v373_v41, %v328_v40  ;;  %v315_v47 = vpop.f32.mrb[1].mxu1 }
  0xfb   :  { %v316_v48 = vpop.f32.mrb[2].mxu1 }
  0xfc   :  { %v314_v49 = vadd.f32 %v313_v44, %v273_v46  ;;  %v276_v50 = vadd.f32 %v376_v45, %v328_v40  ;;  %v318_v51 = vpop.f32.mrb[3].mxu1 }
  0xfe   :  { %403 = vtanh.f32 %v314_v49  ;;  %v317_v52 = vadd.f32 %v316_v48, %v276_v50 }
 0x100   :  { %405 = vtanh.f32 %v317_v52 }
 0x108   :  { %v404_v53 = vpop.eup %403 }
 0x109   :  { %322 = vst [vmem:[%s548_s3] sm:$0xff] %v404_v53 }
 0x10a   :  { %v406_v54 = vpop.eup %405 }
 0x10b   :  { %323 = vst [vmem:[%s548_s3 + $0x8] sm:$0x3] %v406_v54 }

</bundles_post_ra>
